<compile_context>
chip_gen: v7x
topology: tpu7x:2x2x1
jax: 0.10.0
libtpu: 0.0.40
codegen_flags: <defaults>
</compile_context>

<pallas_src>
import jax
import jax.numpy as jnp
from jax.experimental import pallas as pl
from jax.experimental.pallas import tpu as pltpu


def _relu_kernel(x_ref, o_ref):
    x = x_ref[...]
    o_ref[...] = jnp.maximum(x, jnp.asarray(0, x.dtype))


_LANE_CANDIDATES = (2048, 1024, 512, 256, 128)   # lane-dense widths (x128)
_TARGET_BLOCK_BYTES = 2 * 1024 * 1024            # ~2 MiB per block


def relu(x: jax.Array) -> jax.Array:
    """Element-wise ReLU on an arbitrary-shaped feature array (e.g. (N, C))."""
    orig_shape = x.shape
    dtype = x.dtype
    total = x.size
    if total == 0:
        return x

    flat = x.reshape(-1)

    # Pick a lane-dense last dim (multiple of 128) that divides the flattened
    # size so no padding is needed; otherwise pad only the tiny tail.
    lanes = None
    for cand in _LANE_CANDIDATES:
        if total % cand == 0:
            lanes = cand
            break
    if lanes is None:
        lanes = 1024
        padded_total = pl.cdiv(total, lanes) * lanes
        flat = jnp.pad(flat, (0, padded_total - total))
    else:
        padded_total = total

    rows = padded_total // lanes
    x2d = flat.reshape(rows, lanes)

    # ~2 MiB blocks, rows axis a multiple of 8; single full-array block if the
    # input is small (covers the whole array -> always a legal block shape).
    elem_bytes = jnp.dtype(dtype).itemsize
    block_rows = max(8, (_TARGET_BLOCK_BYTES // (lanes * elem_bytes)) // 8 * 8)
    if block_rows >= rows:
        block_rows = rows

    grid = (pl.cdiv(rows, block_rows),)
    out2d = pl.pallas_call(
        _relu_kernel,
        out_shape=jax.ShapeDtypeStruct((rows, lanes), dtype),
        grid_spec=pltpu.PrefetchScalarGridSpec(
            num_scalar_prefetch=0,
            grid=grid,
            in_specs=[pl.BlockSpec((block_rows, lanes), lambda i: (i, 0))],
            out_specs=pl.BlockSpec((block_rows, lanes), lambda i: (i, 0)),
        ),
        compiler_params=pltpu.CompilerParams(
            dimension_semantics=("parallel",),   # shards across v7x's 2 TCs
        ),
    )(x2d)

    out_flat = out2d.reshape(-1)
    if padded_total != total:
        out_flat = out_flat[:total]
    return out_flat.reshape(orig_shape)


if __name__ == "__main__":
    key = jax.random.PRNGKey(0)
    # Small PointTensor-like feature matrix: 1000 points, 32 feature channels.
    x = jax.random.normal(key, (1000, 32), dtype=jnp.float32)

    y = jax.block_until_ready(relu(x))

    # Reference check against plain JAX (exact match expected).
    y_ref = jnp.maximum(x, 0.0)
    assert y.shape == x.shape and y.dtype == x.dtype
    assert bool(jnp.array_equal(y, y_ref))
    print("KERNEL_OK")
</pallas_src>

<mosaic_0001>
module attributes {stable_mosaic.version = 11 : i64} {
  func.func @_relu_kernel(%arg0: i32, %arg1: memref<125x256xf32, #tpu.memory_space<vmem>>, %arg2: memref<125x256xf32, #tpu.memory_space<vmem>>) attributes {dimension_semantics = [#tpu.dimension_semantics<parallel>], iteration_bounds = array<i64: 1>, scalar_prefetch = 0 : i64, scratch_operands = 0 : i64, tpu.core_type = #tpu.core_type<tc>, window_params = [{transform_indices = @transform_0, window_bounds = array<i64: 125, 256>}, {transform_indices = @transform_1, window_bounds = array<i64: 125, 256>}]} {
    %c0 = arith.constant 0 : index
    %c0_0 = arith.constant 0 : index
    %0 = vector.load %arg1[%c0, %c0_0] : memref<125x256xf32, #tpu.memory_space<vmem>>, vector<125x256xf32>
    %cst = arith.constant 0.000000e+00 : f32
    %1 = vector.broadcast %cst : f32 to vector<125x256xf32>
    %2 = arith.maximumf %0, %1 : vector<125x256xf32>
    %c0_1 = arith.constant 0 : index
    %c0_2 = arith.constant 0 : index
    %3 = vector.load %arg2[%c0_1, %c0_2] : memref<125x256xf32, #tpu.memory_space<vmem>>, vector<125x256xf32>
    tpu.vector_store %arg2[%c0_1, %c0_2], %2 {strides = array<i32>} : memref<125x256xf32, #tpu.memory_space<vmem>>, vector<125x256xf32>,
    return
  }
  func.func @transform_0(%arg0: i32) -> (i32, i32) {
    %c0_i32 = arith.constant 0 : i32
    %c0_i32_0 = arith.constant 0 : i32
    return %arg0, %c0_i32 : i32, i32
  }
  func.func @transform_1(%arg0: i32) -> (i32, i32) {
    %c0_i32 = arith.constant 0 : i32
    %c0_i32_0 = arith.constant 0 : i32
    return %arg0, %c0_i32 : i32, i32
  }
}

</mosaic_0001>

<bundles_post_ra>
// kernel: tpu_custom_call.1
= control target key start
LH: loop header
LB: loop body
LE: loop exit
PB: predicated region body
PF: predicated region fallthrough
CT: control target
= control target key end

     0   :  { %6 = vsyncpa [#allocation3], 0  ;;  %s235_s0 = inlined_call_operand.hbm [shape: f32[125,256], index: 0, kind: input, shape index: {}]   ;;  %s236_s1 = inlined_call_operand.hbm [shape: f32[125,256], index: 1, kind: output, shape index: {}]  }
   0x1   :  { %7 = vsyncpa [#allocation4], 0  ;;  %s188_s6 = smov [#allocation2]   ;;  %s140_s10 = scalar_lea.hbm %s235_s0, 4096 }
   0x2   :  { %s13_s7 = sshll.u32 %s188_s6, 4  ;;  %p141_p0 = scmp.ne.s32.totalorder %s235_s0, %s140_s10  ;;  %s14_s7 = int_to_ptr.vmem [resolvable:$true] %s13_s7 }
   0x3   :  { %p144_p1 = scmp.lt.u32.totalorder %s140_s10, %s235_s0 }
   0x5   :  { %p146_p2 = pnand %p144_p1, %p141_p0 }
   0x7   :  { %149 = shalt.err (!%p146_p2)
}
   0x8   :  { %s150_s15 = scalar_lea.vmem %s14_s7, 4096  ;;  %p155_p4 = scmp.lt.s32.totalorder %s14_s7, %s14_s7 }
   0x9   :  { %p151_p3 = scmp.ne.s32.totalorder %s14_s7, %s150_s15  ;;  %p156_p5 = scmp.lt.s32.totalorder %s150_s15, %s150_s15 }
   0xb   :  { %p157_p6 = por %p156_p5, %p155_p4 }
   0xd   :  { %p158_p7 = pnand %p157_p6, %p151_p3 }
   0xf   :  { %161 = shalt.err (!%p158_p7)
}
  0x10   :  { %s189_s16 = smov 256   ;;  %s190_s17 = smov 16  }
  0x11   :  { %19 = dma.hbm_to_vmem [thread:$0]  %s235_s0, 4096, %s14_s7, [#allocation3], %s189_s16, %s189_s16, %s190_s17  }
  0x12   :  { %184 = dma.done.wait [#allocation3], 4096  }
  0x13   :  { %185 = vsyncadd [#allocation3], 4294963200  ;;  %v23_v0 = vld [vmem:[#allocation2] sm:$0xff]  ;;  %v24_v1 = vld [vmem:[#allocation2 + $0x8] sm:$0xff]  ;;  %s191_s20 = smov [#allocation5]  }
  0x14   :  { %v25_v2 = vld [vmem:[#allocation2 + $0x10] sm:$0xff]  ;;  %s217_s21 = sshll.u32 %s191_s20, 4  ;;  %v55_v3 = vmax.f32 %v23_v0, 0.0  ;;  %v56_v4 = vmax.f32 %v24_v1, 0.0  ;;  %v26_v6 = vld [vmem:[#allocation2 + $0x18] sm:$0xff]  ;;  %v27_v7 = vld [vmem:[#allocation2 + $0x20] sm:$0xff]  ;;  %s125_s21 = int_to_ptr.vmem [resolvable:$true] %s217_s21 }
  0x15   :  { %v57_v5 = vmax.f32 %v25_v2, 0.0  ;;  %v28_v8 = vld [vmem:[#allocation2 + $0x28] sm:$0xff]  ;;  %v58_v9 = vmax.f32 %v26_v6, 0.0  ;;  %v59_v10 = vmax.f32 %v27_v7, 0.0  ;;  %v29_v12 = vld [vmem:[#allocation2 + $0x30] sm:$0xff]  ;;  %v30_v13 = vld [vmem:[#allocation2 + $0x38] sm:$0xff]  ;;  %p167_p9 = scmp.lt.s32.totalorder %s125_s21, %s125_s21 }
  0x16   :  { %v60_v11 = vmax.f32 %v28_v8, 0.0  ;;  %v31_v14 = vld [vmem:[#allocation2 + $0x40] sm:$0xff]  ;;  %87 = vst [vmem:[#allocation5] sm:$0xff] %v55_v3  ;;  %88 = vst [vmem:[#allocation5 + $0x8] sm:$0xff] %v56_v4  ;;  %v61_v15 = vmax.f32 %v29_v12, 0.0  ;;  %v62_v16 = vmax.f32 %v30_v13, 0.0 }
  0x17   :  { %89 = vst [vmem:[#allocation5 + $0x10] sm:$0xff] %v57_v5  ;;  %v63_v17 = vmax.f32 %v31_v14, 0.0  ;;  %v32_v18 = vld [vmem:[#allocation2 + $0x48] sm:$0xff]  ;;  %v33_v19 = vld [vmem:[#allocation2 + $0x50] sm:$0xff]  ;;  %v34_v20 = vld [vmem:[#allocation2 + $0x58] sm:$0xff]  ;;  %s162_s0 = scalar_lea.vmem %s125_s21, 4096 }
  0x18   :  { %90 = vst [vmem:[#allocation5 + $0x18] sm:$0xff] %v58_v9  ;;  %91 = vst [vmem:[#allocation5 + $0x20] sm:$0xff] %v59_v10  ;;  %v64_v21 = vmax.f32 %v32_v18, 0.0  ;;  %v65_v22 = vmax.f32 %v33_v19, 0.0  ;;  %v66_v23 = vmax.f32 %v34_v20, 0.0  ;;  %v35_v24 = vld [vmem:[#allocation2 + $0x60] sm:$0xff]  ;;  %p163_p8 = scmp.ne.s32.totalorder %s125_s21, %s162_s0  ;;  %p168_p10 = scmp.lt.s32.totalorder %s162_s0, %s162_s0 }
  0x19   :  { %92 = vst [vmem:[#allocation5 + $0x28] sm:$0xff] %v60_v11  ;;  %v36_v25 = vld [vmem:[#allocation2 + $0x68] sm:$0xff]  ;;  %v37_v26 = vld [vmem:[#allocation2 + $0x70] sm:$0xff]  ;;  %93 = vst [vmem:[#allocation5 + $0x30] sm:$0xff] %v61_v15  ;;  %v67_v27 = vmax.f32 %v35_v24, 0.0 }
  0x1a   :  { %94 = vst [vmem:[#allocation5 + $0x38] sm:$0xff] %v62_v16  ;;  %95 = vst [vmem:[#allocation5 + $0x40] sm:$0xff] %v63_v17  ;;  %v68_v28 = vmax.f32 %v36_v25, 0.0  ;;  %v69_v29 = vmax.f32 %v37_v26, 0.0  ;;  %v38_v30 = vld [vmem:[#allocation2 + $0x78] sm:$0xff]  ;;  %v39_v31 = vld [vmem:[#allocation2 + $0x80] sm:$0xff]  ;;  %p169_p11 = por %p168_p10, %p167_p9 }
  0x1b   :  { %v40_v32 = vld [vmem:[#allocation2 + $0x88] sm:$0xff]  ;;  %96 = vst [vmem:[#allocation5 + $0x48] sm:$0xff] %v64_v21  ;;  %97 = vst [vmem:[#allocation5 + $0x50] sm:$0xff] %v65_v22  ;;  %v70_v33 = vmax.f32 %v38_v30, 0.0  ;;  %v71_v34 = vmax.f32 %v39_v31, 0.0  ;;  %v41_v36 = vld [vmem:[#allocation2 + $0x90] sm:$0xff] }
  0x1c   :  { %98 = vst [vmem:[#allocation5 + $0x58] sm:$0xff] %v66_v23  ;;  %v72_v35 = vmax.f32 %v40_v32, 0.0  ;;  %v42_v37 = vld [vmem:[#allocation2 + $0x98] sm:$0xff]  ;;  %v43_v38 = vld [vmem:[#allocation2 + $0xa0] sm:$0xff]  ;;  %99 = vst [vmem:[#allocation5 + $0x60] sm:$0xff] %v67_v27  ;;  %v73_v39 = vmax.f32 %v41_v36, 0.0  ;;  %p170_p12 = pnand %p169_p11, %p163_p8 }
  0x1d   :  { %100 = vst [vmem:[#allocation5 + $0x68] sm:$0xff] %v68_v28  ;;  %101 = vst [vmem:[#allocation5 + $0x70] sm:$0xff] %v69_v29  ;;  %v74_v40 = vmax.f32 %v42_v37, 0.0  ;;  %v75_v41 = vmax.f32 %v43_v38, 0.0  ;;  %v44_v42 = vld [vmem:[#allocation2 + $0xa8] sm:$0xff]  ;;  %v45_v43 = vld [vmem:[#allocation2 + $0xb0] sm:$0xff] }
  0x1e   :  { %v46_v44 = vld [vmem:[#allocation2 + $0xb8] sm:$0xff]  ;;  %102 = vst [vmem:[#allocation5 + $0x78] sm:$0xff] %v70_v33  ;;  %103 = vst [vmem:[#allocation5 + $0x80] sm:$0xff] %v71_v34  ;;  %v76_v45 = vmax.f32 %v44_v42, 0.0  ;;  %v77_v46 = vmax.f32 %v45_v43, 0.0  ;;  %v47_v48 = vld [vmem:[#allocation2 + $0xc0] sm:$0xff] }
  0x1f   :  { %104 = vst [vmem:[#allocation5 + $0x88] sm:$0xff] %v72_v35  ;;  %v78_v47 = vmax.f32 %v46_v44, 0.0  ;;  %v48_v49 = vld [vmem:[#allocation2 + $0xc8] sm:$0xff]  ;;  %v49_v50 = vld [vmem:[#allocation2 + $0xd0] sm:$0xff]  ;;  %105 = vst [vmem:[#allocation5 + $0x90] sm:$0xff] %v73_v39  ;;  %v79_v51 = vmax.f32 %v47_v48, 0.0 }
  0x20   :  { %106 = vst [vmem:[#allocation5 + $0x98] sm:$0xff] %v74_v40  ;;  %107 = vst [vmem:[#allocation5 + $0xa0] sm:$0xff] %v75_v41  ;;  %v80_v52 = vmax.f32 %v48_v49, 0.0  ;;  %v81_v53 = vmax.f32 %v49_v50, 0.0  ;;  %v50_v54 = vld [vmem:[#allocation2 + $0xd8] sm:$0xff]  ;;  %v51_v55 = vld [vmem:[#allocation2 + $0xe0] sm:$0xff] }
  0x21   :  { %v52_v56 = vld [vmem:[#allocation2 + $0xe8] sm:$0xff]  ;;  %108 = vst [vmem:[#allocation5 + $0xa8] sm:$0xff] %v76_v45  ;;  %109 = vst [vmem:[#allocation5 + $0xb0] sm:$0xff] %v77_v46  ;;  %v82_v57 = vmax.f32 %v50_v54, 0.0  ;;  %v83_v58 = vmax.f32 %v51_v55, 0.0 }
  0x22   :  { %110 = vst [vmem:[#allocation5 + $0xb8] sm:$0xff] %v78_v47  ;;  %v84_v59 = vmax.f32 %v52_v56, 0.0  ;;  %v53_v60 = vld [vmem:[#allocation2 + $0xf0] sm:$0x1f]  ;;  %111 = vst [vmem:[#allocation5 + $0xc0] sm:$0xff] %v79_v51 }
  0x23   :  { %112 = vst [vmem:[#allocation5 + $0xc8] sm:$0xff] %v80_v52  ;;  %113 = vst [vmem:[#allocation5 + $0xd0] sm:$0xff] %v81_v53  ;;  %v85_v61 = vmax.f32 %v53_v60, 0.0  ;;  %v54_v62 = vld [vmem:[#allocation2 + $0xf8] sm:$0x1f] }
  0x24   :  { %114 = vst [vmem:[#allocation5 + $0xd8] sm:$0xff] %v82_v57  ;;  %115 = vst [vmem:[#allocation5 + $0xe0] sm:$0xff] %v83_v58  ;;  %v86_v63 = vmax.f32 %v54_v62, 0.0 }
  0x25   :  { %116 = vst [vmem:[#allocation5 + $0xe8] sm:$0xff] %v84_v59  ;;  %117 = vst [vmem:[#allocation5 + $0xf0] sm:$0x1f] %v85_v61 }
  0x26   :  { %118 = vst [vmem:[#allocation5 + $0xf8] sm:$0x1f] %v86_v63 }
  0x27   :  { %173 = shalt.err (!%p170_p12)
}
  0x28   :  { %s174_s24 = scalar_lea.hbm %s236_s1, 4096 }
  0x29   :  { %p175_p13 = scmp.ne.s32.totalorder %s236_s1, %s174_s24  ;;  %p178_p0 = scmp.lt.u32.totalorder %s174_s24, %s236_s1 }
  0x2b   :  { %p180_p1 = pnand %p178_p0, %p175_p13 }
  0x2d   :  { %183 = shalt.err (!%p180_p1)
}
  0x2e   :  { %130 = dma.vmem_to_hbm [thread:$0]  %s125_s21, 4096, %s236_s1, [#allocation4], %s189_s16, %s189_s16, %s190_s17  }
  0x2f   :  { %186 = dma.done.wait [#allocation4], 4096  }
  0x30   :  { %187 = vsyncadd [#allocation4], 4294963200 }
  0x31   :  { %134 = vsyncpa [#allocation3], 1 }
  0x32   :  { %135 = vsyncpa [#allocation4], 1 }

</bundles_post_ra>
